<compile_context>
chip_gen: v5e
topology: v5e:2x2
jax: 0.10.0
libtpu: 0.0.40
codegen_flags: <defaults>
</compile_context>

<pallas_src>
import math
from functools import partial

import jax
import jax.numpy as jnp
from jax.experimental import pallas as pl
from jax.experimental.pallas import tpu as pltpu


def _gate_kernel(x_ref, w_ref, logits_ref, gate_ref, *, logit_threshold):
    # x_ref: (Tb, H)   w_ref: (E, H)   logits_ref: (E, Tb)   gate_ref: (E, Tb)
    x = x_ref[...]
    w = w_ref[...]
    # Linear (no bias) in lane-dense [E, Tb] orientation: contract both
    # operands on H.  The weight [E, H] is already standard [M, K] for the
    # MXU; the result's large T axis lands on the 128-lane dim so both
    # output stores are unmasked, lane-dense `vst` slabs.
    logits = jax.lax.dot_general(
        w, x,
        dimension_numbers=(((1,), (1,)), ((), ())),
        preferred_element_type=jnp.float32,
    )
    logits_ref[...] = logits.astype(logits_ref.dtype)
    # sigmoid(logits) > threshold  <=>  logits > logit(threshold)  (monotonic)
    gate_ref[...] = (logits > logit_threshold).astype(gate_ref.dtype)


def _logit_threshold(threshold: float) -> float:
    # Fold the probability threshold into logit space.
    if threshold <= 0.0:
        return -math.inf   # sigmoid(x) > 0 is always True
    if threshold >= 1.0:
        return math.inf    # sigmoid(x) > 1 is never True
    return math.log(threshold / (1.0 - threshold))


def _pick_block_t(T, H, E, gate_itemsize, budget_bytes):
    """Largest 128-multiple T tile whose double-buffered tiles fit the budget,
    clamped so the grid has at least 2 steps (v7x megacore sharding)."""
    fixed = 2 * E * H * 4                                   # weight (double-buffered, worst case)
    per_row = 2 * (H * 4 + E * 4 + E * gate_itemsize)       # x tile + both output tiles
    max_rows = max((budget_bytes - fixed) // per_row, 128)
    bt = max((max_rows // 128) * 128, 128)
    # >= 2 grid steps when possible so the "parallel" T axis lands on both
    # TensorCores on v7x (near-zero cost on single-TC v5e/v6e).
    half = -(-T // 2)
    two_step = max(((half + 127) // 128) * 128, 128)
    return min(bt, two_step)


def gate_forward(
    x,
    weight,
    threshold,
    *,
    gate_dtype=jnp.int32,
    block_t=None,
    vmem_budget_bytes=20 * 1024 * 1024,
    tile_threshold_rows=2048,
):
    """Gate forward pass.

    x:       [T, H] float32  (CLS hidden states)
    weight:  [E, H] float32  (nn.Linear weight layout)
    returns: (gating_logits [T, E] float32, gating_output [T, E] gate_dtype)
    """
    T, H = x.shape
    E, H2 = weight.shape
    assert H == H2

    logit_thr = _logit_threshold(float(threshold))
    kernel = partial(_gate_kernel, logit_threshold=logit_thr)
    gate_isize = jnp.dtype(gate_dtype).itemsize

    # Lane-dense [E, T] kernel outputs; transposed back to [T, E] below.
    out_shapes = (
        jax.ShapeDtypeStruct((E, T), jnp.float32),
        jax.ShapeDtypeStruct((E, T), gate_dtype),
    )
    total_bytes = T * H * 4 + E * H * 4 + E * T * 4 + E * T * gate_isize
    cost = pl.CostEstimate(
        flops=2 * T * H * E,
        transcendentals=0,
        bytes_accessed=int(total_bytes),
    )
    # Explicit scoped-VMEM limit so tile sizing is uniform across generations
    # (v5e's default scoped limit is only 16 MiB; 32 MiB is safely within
    # physical VMEM on v5e/v6e (128 MiB) and v7x (64 MiB)).
    vmem_limit = 32 * 1024 * 1024

    use_single = (
        block_t is None
        and total_bytes <= vmem_budget_bytes
        and T < tile_threshold_rows   # large T goes tiled so v7x can use both TCs
    )

    if use_single:
        # Latency regime: single block, no grid, whole arrays resident in
        # VMEM — no per-step pipeline bookkeeping (~0.35us/step saved).
        logits_et, gate_et = pl.pallas_call(
            kernel,
            out_shape=out_shapes,
            in_specs=[
                pl.BlockSpec(memory_space=pltpu.MemorySpace.VMEM),
                pl.BlockSpec(memory_space=pltpu.MemorySpace.VMEM),
            ],
            out_specs=(
                pl.BlockSpec(memory_space=pltpu.MemorySpace.VMEM),
                pl.BlockSpec(memory_space=pltpu.MemorySpace.VMEM),
            ),
            compiler_params=pltpu.CompilerParams(vmem_limit_bytes=vmem_limit),
            cost_estimate=cost,
        )(x, weight)
    else:
        if block_t is None:
            block_t = _pick_block_t(T, H, E, gate_isize, vmem_budget_bytes)
        block_t = max(128, (block_t // 128) * 128)
        grid = (pl.cdiv(T, block_t),)
        logits_et, gate_et = pl.pallas_call(
            kernel,
            out_shape=out_shapes,
            grid_spec=pltpu.PrefetchScalarGridSpec(
                num_scalar_prefetch=0,
                grid=grid,
                in_specs=[
                    pl.BlockSpec((block_t, H), lambda i: (i, 0)),
                    pl.BlockSpec((E, H), lambda i: (0, 0)),   # weight VMEM-resident
                ],
                out_specs=(
                    pl.BlockSpec((E, block_t), lambda i: (0, i)),
                    pl.BlockSpec((E, block_t), lambda i: (0, i)),
                ),
            ),
            compiler_params=pltpu.CompilerParams(
                dimension_semantics=("parallel",),
                vmem_limit_bytes=vmem_limit,
            ),
            cost_estimate=cost,
        )(x, weight)

    # Back to the reference [T, E] layout (E=num_experts is tiny; this is
    # cheap layout plumbing outside the kernel).
    return logits_et.T, gate_et.T


def _reference(x, w, threshold):
    ref_logits = x @ w.T
    ref_gate = jnp.where(jax.nn.sigmoid(ref_logits) > threshold, 1, 0).astype(jnp.int32)
    return ref_logits, ref_gate


def _check(logits, gate, x, w, threshold):
    ref_logits, ref_gate = _reference(x, w, threshold)
    assert logits.shape == ref_logits.shape and gate.shape == ref_gate.shape
    assert jnp.allclose(logits, ref_logits, atol=1e-5, rtol=1e-5)
    # The logit-space threshold fold is mathematically exact but not bit-exact
    # vs. sigmoid-then-compare for logits within ~1e-7 of the threshold; allow
    # gate disagreement only in that boundary band.
    mismatch = gate.astype(jnp.int32) != ref_gate
    near_boundary = jnp.abs(jax.nn.sigmoid(ref_logits) - threshold) < 1e-6
    assert bool(jnp.all(jnp.logical_or(~mismatch, near_boundary)))


if __name__ == "__main__":
    # Config-like small shapes: hidden_size=32, num_local_experts=8, threshold=0.5
    hidden_size = 32
    num_experts = 8
    threshold = 0.5

    key = jax.random.PRNGKey(0)
    kx, kw, kx2, kx3 = jax.random.split(key, 4)
    w = jax.random.normal(kw, (num_experts, hidden_size), dtype=jnp.float32) * 0.1

    # --- Small (latency) path: a handful of CLS hidden states ---------------
    x = jax.random.normal(kx, (8, hidden_size), dtype=jnp.float32)
    logits, gate = gate_forward(x, w, threshold)
    jax.block_until_ready((logits, gate))
    _check(logits, gate, x, w, threshold)

    # --- Tiled path: large T, divisible, grid >= 2 "parallel" steps ---------
    x_big = jax.random.normal(kx2, (4096, hidden_size), dtype=jnp.float32)
    logits_b, gate_b = gate_forward(x_big, w, threshold)
    jax.block_until_ready((logits_b, gate_b))
    _check(logits_b, gate_b, x_big, w, threshold)

    # --- Tiled path: T not divisible by block_t (edge-block masking) --------
    x_odd = jax.random.normal(kx3, (2500, hidden_size), dtype=jnp.float32)
    logits_o, gate_o = gate_forward(x_odd, w, threshold)
    jax.block_until_ready((logits_o, gate_o))
    _check(logits_o, gate_o, x_odd, w, threshold)

    print("KERNEL_OK")
</pallas_src>

<mosaic_0001>
module attributes {stable_mosaic.version = 11 : i64} {
  func.func @_gate_kernel(%arg0: memref<8x32xf32, #tpu.memory_space<vmem>>, %arg1: memref<8x32xf32, #tpu.memory_space<vmem>>, %arg2: memref<8x8xf32, #tpu.memory_space<vmem>>, %arg3: memref<8x8xi32, #tpu.memory_space<vmem>>) attributes {dimension_semantics = [], scalar_prefetch = 0 : i64, scratch_operands = 0 : i64, tpu.core_type = #tpu.core_type<tc>} {
    %c0 = arith.constant 0 : index
    %c0_0 = arith.constant 0 : index
    %0 = vector.load %arg0[%c0, %c0_0] : memref<8x32xf32, #tpu.memory_space<vmem>>, vector<8x32xf32>
    %c0_1 = arith.constant 0 : index
    %c0_2 = arith.constant 0 : index
    %1 = vector.load %arg1[%c0_1, %c0_2] : memref<8x32xf32, #tpu.memory_space<vmem>>, vector<8x32xf32>
    %cst = arith.constant dense<0.000000e+00> : vector<8x8xf32>
    %2 = tpu.matmul %1, %0, %cst {dimension_numbers = #tpu.dot_dimension_numbers<[1], [1], [0], [0], [0, 0, 1, 0], [], []>} : vector<8x32xf32>, vector<8x32xf32>, vector<8x8xf32> -> vector<8x8xf32>
    %c0_3 = arith.constant 0 : index
    %c0_4 = arith.constant 0 : index
    %3 = vector.load %arg2[%c0_3, %c0_4] : memref<8x8xf32, #tpu.memory_space<vmem>>, vector<8x8xf32>
    tpu.vector_store %arg2[%c0_3, %c0_4], %2 {strides = array<i32>} : memref<8x8xf32, #tpu.memory_space<vmem>>, vector<8x8xf32>,
    %cst_5 = arith.constant 0.000000e+00 : f32
    %4 = vector.broadcast %cst_5 : f32 to vector<8x8xf32>
    %5 = arith.cmpf ogt, %2, %4 : vector<8x8xf32>
    %6 = arith.extui %5 : vector<8x8xi1> to vector<8x8xi32>
    %c0_6 = arith.constant 0 : index
    %c0_7 = arith.constant 0 : index
    %7 = vector.load %arg3[%c0_6, %c0_7] : memref<8x8xi32, #tpu.memory_space<vmem>>, vector<8x8xi32>
    tpu.vector_store %arg3[%c0_6, %c0_7], %6 {strides = array<i32>} : memref<8x8xi32, #tpu.memory_space<vmem>>, vector<8x8xi32>,
    return
  }
}

</mosaic_0001>

<bundles_post_ra>
// kernel: tpu_custom_call.1
= control target key start
LH: loop header
LB: loop body
LE: loop exit
PB: predicated region body
PF: predicated region fallthrough
CT: control target
= control target key end

     0   :  { %9 = vsyncpa [#allocation3], 0  ;;  %s259_s0 = inlined_call_operand.hbm [shape: f32[8,32], index: 0, kind: input, shape index: {}]   ;;  %s260_s1 = inlined_call_operand.hbm [shape: f32[8,32], index: 1, kind: input, shape index: {}]   ;;  %s261_s2 = inlined_call_operand.hbm [shape: f32[8,8], index: 2, kind: output, shape index: {0}]   ;;  %s262_s3 = inlined_call_operand.hbm [shape: s32[8,8], index: 3, kind: output, shape index: {1}]  }
   0x1   :  { %10 = vsyncpa [#allocation6], 0 }
   0x2   :  { %11 = vsyncpa [#allocation4], 0 }
   0x3   :  { %12 = vsyncpa [#allocation9], 0  ;;  %s18_s14 = sshll.u32 %s259_s0, 4  ;;  %s222_s15 = smov [#allocation2]   ;;  %s19_s14 = int_to_ptr.hbm [resolvable:$true] %s18_s14 }
   0x4   :  { %s20_s16 = sshll.u32 %s222_s15, 4  ;;  %s29_s19 = sshll.u32 %s260_s1, 4  ;;  %s21_s16 = int_to_ptr.vmem [resolvable:$true] %s20_s16  ;;  %s30_s19 = int_to_ptr.hbm [resolvable:$true] %s29_s19 }
   0x5   :  { %23 = dma.hbm_to_vmem [thread:$0]  %s19_s14, 128, %s21_s16, [#allocation3]  }
   0x6   :  { %s223_s20 = smov [#allocation5]  }
   0x7   :  { %s31_s21 = sshll.u32 %s223_s20, 4  ;;  %s32_s21 = int_to_ptr.vmem [resolvable:$true] %s31_s21 }
   0x8   :  { %34 = dma.hbm_to_vmem [thread:$0]  %s30_s19, 128, %s32_s21, [#allocation6]  }
   0x9   :  { %214 = dma.done.wait [#allocation3], 128  }
   0xa   :  { %215 = vsyncadd [#allocation3], 4294967168 }
   0xb   :  { %216 = dma.done.wait [#allocation6], 128  }
   0xc   :  { %217 = vsyncadd [#allocation6], 4294967168  ;;  %vm45_vm0 = vcmask 261120   ;;  %v43_v0 = vld [vmem:[#allocation2] sm:$0xff]  ;;  %v44_v1 = vld [vmem:[#allocation5] sm:$0xff]  ;;  %s224_s0 = smov [#allocation7]  }
   0xd   :  { %111 = vmatpush.xpose.msk.msra.mxu0 %vm45_vm0, %v43_v0  ;;  %s82_s22 = sshll.u32 %s224_s0, 4  ;;  %s84_s1 = sshll.u32 %s261_s2, 4  ;;  %vm72_vm1 = vcmask 64512   ;;  %v226_v3 = vmov 0   ;;  %s83_s22 = int_to_ptr.vmem [resolvable:$true] %s82_s22  ;;  %s85_s1 = int_to_ptr.hbm [resolvable:$true] %s84_s1 }
   0xe   :  { %s225_s25 = smov [#allocation8]   ;;  %s95_s29 = sshll.u32 %s262_s3, 4  ;;  %s96_s29 = int_to_ptr.hbm [resolvable:$true] %s95_s29 }
   0xf   :  { %s93_s26 = sshll.u32 %s225_s25, 4  ;;  %s94_s26 = int_to_ptr.vmem [resolvable:$true] %s93_s26 }
  0x10   :  { %112 = vmatmul.msk.f32.vlgmr.msra.gmra.mxu0 %vm45_vm0, %v44_v1 }
  0x8d   :  { %v69_v2 = vpop.f32.mrf.mxu0 }
  0x8e   :  { %73 = vst.msk [vmem:[#allocation7] sm:$0xff] %vm72_vm1, %v69_v2  ;;  %vm74_vm2 = vcmp.gt.f32.partialorder %v69_v2, 0.0 }
  0x8f   :  { %v75_v4 = vsel %vm74_vm2, 1, %v226_v3  ;;  %87 = dma.vmem_to_hbm [thread:$0]  %s83_s22, 128, %s85_s1, [#allocation4]  }
  0x90   :  { %76 = vst.msk [vmem:[#allocation8] sm:$0xff] %vm72_vm1, %v75_v4 }
  0x91   :  { %98 = dma.vmem_to_hbm [thread:$0]  %s94_s26, 128, %s96_s29, [#allocation9]  }
  0x92   :  { %218 = dma.done.wait [#allocation4], 128  }
  0x93   :  { %219 = vsyncadd [#allocation4], 4294967168 }
  0x94   :  { %220 = dma.done.wait [#allocation9], 128  }
  0x95   :  { %221 = vsyncadd [#allocation9], 4294967168 }
  0x96   :  { %107 = vsyncpa [#allocation3], 1 }
  0x97   :  { %108 = vsyncpa [#allocation6], 1 }
  0x98   :  { %109 = vsyncpa [#allocation4], 1 }
  0x99   :  { %110 = vsyncpa [#allocation9], 1 }

</bundles_post_ra>
